<compile_context>
chip_gen: v6e
topology: v6e:2x2x1
jax: 0.10.0
libtpu: 0.0.40
codegen_flags: <defaults>
</compile_context>

<pallas_src>
import math
import jax
import jax.numpy as jnp
from jax import lax
from jax.experimental import pallas as pl
from jax.experimental.pallas import tpu as pltpu


# ---------------------------------------------------------------------------
# Helpers
# ---------------------------------------------------------------------------
def _round_up(x, m):
    return (x + m - 1) // m * m


def _vmem_capacity_bytes():
    """Per-TensorCore VMEM capacity; conservative fallback if query fails."""
    try:
        return int(pltpu.get_tpu_info().vmem_capacity_bytes)
    except Exception:
        return 64 * 1024 * 1024  # v7x-sized (smallest current generation)


def _divisor_tiles(dim_pad):
    """All multiples of 128 that divide dim_pad (which is a multiple of 128),
    descending."""
    n = dim_pad // 128
    return sorted({128 * d for d in range(1, n + 1) if n % d == 0}, reverse=True)


def _select_tiles(bm, in_pad, out_pad, weight_bytes, training, vmem_cap):
    """Pick (tn, tk): largest tiles whose double-buffered pipeline footprint
    fits a per-generation VMEM budget."""
    budget = int(vmem_cap * 0.5)          # headroom for compiler scratch etc.
    n_weight_streams = 2 if training else 1

    tn_opts = _divisor_tiles(out_pad)
    tk_opts = _divisor_tiles(in_pad)

    # v7x (64 MiB VMEM/TC, 2 TCs): guarantee >= 2 N blocks so the "parallel"
    # N axis actually shards across both TensorCores.  No-op on v5e/v6e.
    if vmem_cap <= 64 * 1024 * 1024 and out_pad >= 256:
        tn_opts = [t for t in tn_opts if out_pad // t >= 2]

    best = None
    for tn in tn_opts:
        for tk in tk_opts:
            w_bytes = n_weight_streams * 2 * tn * tk * weight_bytes  # 2x buffered
            x_bytes = 2 * bm * tk * 4
            o_bytes = 2 * bm * tn * 4 + bm * tn * 4                  # out + acc
            misc = 2 * (tk + 5 * tn) * 4 * 2                         # eps / bias rows
            if w_bytes + x_bytes + o_bytes + misc <= budget:
                score = tn * tk                                      # min grid steps
                if best is None or score > best[0]:
                    best = (score, tn, tk)
    if best is None:
        return 128, 128
    return best[1], best[2]


# ---------------------------------------------------------------------------
# Pallas kernels
# ---------------------------------------------------------------------------
def _noisy_linear_train_kernel(x_ref, wmu_ref, wsig_ref, ein_ref, eout_ref,
                               bmu_ref, bsig_ref, beps_ref, o_ref, acc_ref):
    k = pl.program_id(2)

    @pl.when(k == 0)
    def _():
        acc_ref[...] = jnp.zeros_like(acc_ref)

    cdt = wmu_ref.dtype                      # f32, or bf16 if streaming bf16 weights
    x = x_ref[...]                           # (bm, tk) f32
    xn = x * ein_ref[...]                    # noise-scaled activations, (bm, tk)

    # Re-associated rank-1 noise:
    #   y = x @ W_mu^T + eps_out * ((x * eps_in) @ W_sigma^T)
    # Weight tiles go straight from DMA to the MXU; no (tn, tk) intermediate.
    mu_part = lax.dot_general(
        x.astype(cdt), wmu_ref[...],
        dimension_numbers=(((1,), (1,)), ((), ())),
        preferred_element_type=jnp.float32)
    sig_part = lax.dot_general(
        xn.astype(cdt), wsig_ref[...],
        dimension_numbers=(((1,), (1,)), ((), ())),
        preferred_element_type=jnp.float32)

    # eout: (1, tn) row -> free sublane broadcast over the (bm, tn) result.
    acc_ref[...] += mu_part + sig_part * eout_ref[...]

    @pl.when(k == pl.num_programs(2) - 1)
    def _():
        b_eff = bmu_ref[...] + bsig_ref[...] * beps_ref[...]   # (1, tn)
        o_ref[...] = (acc_ref[...] + b_eff).astype(o_ref.dtype)


def _noisy_linear_eval_kernel(x_ref, wmu_ref, bmu_ref, o_ref, acc_ref):
    k = pl.program_id(2)

    @pl.when(k == 0)
    def _():
        acc_ref[...] = jnp.zeros_like(acc_ref)

    cdt = wmu_ref.dtype
    acc_ref[...] += lax.dot_general(
        x_ref[...].astype(cdt), wmu_ref[...],
        dimension_numbers=(((1,), (1,)), ((), ())),
        preferred_element_type=jnp.float32)

    @pl.when(k == pl.num_programs(2) - 1)
    def _():
        o_ref[...] = (acc_ref[...] + bmu_ref[...]).astype(o_ref.dtype)


# ---------------------------------------------------------------------------
# Parameter preparation (pad ONCE, not per forward call)
# ---------------------------------------------------------------------------
def prepare_noisy_linear_params(params, weight_dtype=jnp.float32):
    """Pads the NoisyLinear tensors to lane/MXU-friendly shapes once.
    weight_dtype=jnp.bfloat16 opts into bf16 weight streaming (f32 accumulate);
    biases / noise vectors stay f32."""
    out_f, in_f = params["weight_mu"].shape
    in_pad = _round_up(in_f, 128)
    out_pad = _round_up(out_f, 128)

    def pad2(a, r, c):
        pr, pc = r - a.shape[0], c - a.shape[1]
        return jnp.pad(a, ((0, pr), (0, pc))) if (pr or pc) else a

    return dict(
        in_features=in_f, out_features=out_f,
        in_pad=in_pad, out_pad=out_pad,
        weight_mu=pad2(params["weight_mu"], out_pad, in_pad).astype(weight_dtype),
        weight_sigma=pad2(params["weight_sigma"], out_pad, in_pad).astype(weight_dtype),
        eps_in=pad2(params["weight_eps_in"].reshape(1, in_f), 1, in_pad),
        eps_out=pad2(params["weight_eps_out"].reshape(1, out_f), 1, out_pad),
        bias_mu=pad2(params["bias_mu"].reshape(1, out_f), 1, out_pad),
        bias_sigma=pad2(params["bias_sigma"].reshape(1, out_f), 1, out_pad),
        bias_epsilon=pad2(params["bias_epsilon"].reshape(1, out_f), 1, out_pad),
    )


# ---------------------------------------------------------------------------
# Wrapper
# ---------------------------------------------------------------------------
def noisy_linear_forward(x, prep, *, training=True):
    """x: (B, in_features). prep: output of prepare_noisy_linear_params."""
    B, in_f = x.shape
    assert in_f == prep["in_features"]
    out_f, out_pad, in_pad = prep["out_features"], prep["out_pad"], prep["in_pad"]
    dtype = x.dtype

    # Batch tiling: bounded (bm, *) activation / accumulator tiles.
    bm = min(_round_up(B, 8), 512)
    b_pad = _round_up(B, bm)
    if b_pad != B or in_pad != in_f:
        x = jnp.pad(x, ((0, b_pad - B), (0, in_pad - in_f)))

    weight_bytes = jnp.dtype(prep["weight_mu"].dtype).itemsize
    vmem_cap = _vmem_capacity_bytes()
    tn, tk = _select_tiles(bm, in_pad, out_pad, weight_bytes, training, vmem_cap)
    vmem_limit = min(int(vmem_cap * 0.75), 100 * 1024 * 1024)

    n_blocks, m_blocks, k_blocks = out_pad // tn, b_pad // bm, in_pad // tk
    grid = (n_blocks, m_blocks, k_blocks)                   # reduction (K) last

    x_spec = pl.BlockSpec((bm, tk), lambda n, m, k: (m, k))
    w_spec = pl.BlockSpec((tn, tk), lambda n, m, k: (n, k))
    row_k_spec = pl.BlockSpec((1, tk), lambda n, m, k: (0, k))   # eps_in
    row_n_spec = pl.BlockSpec((1, tn), lambda n, m, k: (0, n))   # eps_out / biases
    out_spec = pl.BlockSpec((bm, tn), lambda n, m, k: (m, n))    # resident over K
    out_shape = jax.ShapeDtypeStruct((b_pad, out_pad), dtype)
    scratch = [pltpu.VMEM((bm, tn), jnp.float32)]

    cparams = pltpu.CompilerParams(
        dimension_semantics=("parallel", "parallel", "arbitrary"),
        vmem_limit_bytes=vmem_limit)

    n_streams = 2 if training else 1
    cost = pl.CostEstimate(
        flops=2 * b_pad * out_pad * in_pad * n_streams,
        transcendentals=0,
        bytes_accessed=int(m_blocks * n_streams * out_pad * in_pad * weight_bytes
                           + n_blocks * b_pad * in_pad * 4
                           + b_pad * out_pad * jnp.dtype(dtype).itemsize))

    if training:
        yp = pl.pallas_call(
            _noisy_linear_train_kernel,
            out_shape=out_shape,
            grid_spec=pltpu.PrefetchScalarGridSpec(
                num_scalar_prefetch=0,
                grid=grid,
                in_specs=[x_spec, w_spec, w_spec, row_k_spec, row_n_spec,
                          row_n_spec, row_n_spec, row_n_spec],
                out_specs=out_spec,
                scratch_shapes=scratch),
            compiler_params=cparams,
            cost_estimate=cost,
        )(x, prep["weight_mu"], prep["weight_sigma"], prep["eps_in"],
          prep["eps_out"], prep["bias_mu"], prep["bias_sigma"],
          prep["bias_epsilon"])
    else:
        yp = pl.pallas_call(
            _noisy_linear_eval_kernel,
            out_shape=out_shape,
            grid_spec=pltpu.PrefetchScalarGridSpec(
                num_scalar_prefetch=0,
                grid=grid,
                in_specs=[x_spec, w_spec, row_n_spec],
                out_specs=out_spec,
                scratch_shapes=scratch),
            compiler_params=cparams,
            cost_estimate=cost,
        )(x, prep["weight_mu"], prep["bias_mu"])

    return yp[:B, :out_f]


# ---------------------------------------------------------------------------
# Deterministic parameter construction (mirrors __init__ / reset_parameters /
# reset_noise of the PyTorch module).  Keeps the factorized noise vectors in
# addition to the full weight_epsilon buffer (used only by the reference).
# ---------------------------------------------------------------------------
def make_noisy_linear_params(key, in_features, out_features, std_init=0.5):
    k_wmu, k_bmu, k_ein, k_eout = jax.random.split(key, 4)
    mu_range = 1.0 / math.sqrt(in_features)

    weight_mu = jax.random.uniform(
        k_wmu, (out_features, in_features), jnp.float32, -mu_range, mu_range)
    weight_sigma = jnp.full((out_features, in_features),
                            std_init / math.sqrt(in_features), jnp.float32)
    bias_mu = jax.random.uniform(
        k_bmu, (out_features,), jnp.float32, -mu_range, mu_range)
    bias_sigma = jnp.full((out_features,),
                          std_init / math.sqrt(out_features), jnp.float32)

    def scale_noise(k, size):
        v = jax.random.normal(k, (size,), jnp.float32)
        return jnp.sign(v) * jnp.sqrt(jnp.abs(v))

    eps_in = scale_noise(k_ein, in_features)
    eps_out = scale_noise(k_eout, out_features)
    weight_epsilon = jnp.outer(eps_out, eps_in)     # ger(eps_out, eps_in)
    bias_epsilon = eps_out

    return dict(weight_mu=weight_mu, weight_sigma=weight_sigma,
                weight_epsilon=weight_epsilon,
                weight_eps_in=eps_in, weight_eps_out=eps_out,
                bias_mu=bias_mu, bias_sigma=bias_sigma,
                bias_epsilon=bias_epsilon)


# ---------------------------------------------------------------------------
# Pure-JAX reference (uses the full weight_epsilon buffer, like PyTorch).
# ---------------------------------------------------------------------------
def reference_forward(x, p, training=True):
    if training:
        w = p["weight_mu"] + p["weight_sigma"] * p["weight_epsilon"]
        b = p["bias_mu"] + p["bias_sigma"] * p["bias_epsilon"]
    else:
        w, b = p["weight_mu"], p["bias_mu"]
    return x @ w.T + b


if __name__ == "__main__":
    key = jax.random.PRNGKey(0)
    k_param, k_x = jax.random.split(key)

    in_features, out_features, batch = 32, 64, 4
    params = make_noisy_linear_params(k_param, in_features, out_features)
    x = jax.random.normal(k_x, (batch, in_features), jnp.float32)

    # Pad / lay out the parameters once (f32: bit-compatible with the reference).
    prep = prepare_noisy_linear_params(params)

    y_train = jax.block_until_ready(noisy_linear_forward(x, prep, training=True))
    y_eval = jax.block_until_ready(noisy_linear_forward(x, prep, training=False))

    ref_train = reference_forward(x, params, training=True)
    ref_eval = reference_forward(x, params, training=False)

    assert y_train.shape == (batch, out_features)
    assert y_eval.shape == (batch, out_features)
    assert jnp.allclose(y_train, ref_train, atol=1e-5, rtol=1e-5)
    assert jnp.allclose(y_eval, ref_eval, atol=1e-5, rtol=1e-5)

    # Opt-in bf16 weight streaming (halves weight HBM traffic; f32 accumulate).
    prep_bf16 = prepare_noisy_linear_params(params, weight_dtype=jnp.bfloat16)
    y_bf16 = jax.block_until_ready(noisy_linear_forward(x, prep_bf16, training=True))
    assert y_bf16.shape == (batch, out_features)
    assert jnp.allclose(y_bf16, ref_train, atol=5e-2, rtol=5e-2)

    print("KERNEL_OK")
</pallas_src>

<mosaic_0001>
module attributes {stable_mosaic.version = 11 : i64} {
  func.func @_noisy_linear_train_kernel(%arg0: i32, %arg1: i32, %arg2: i32, %arg3: memref<8x128xf32, #tpu.memory_space<vmem>>, %arg4: memref<128x128xf32, #tpu.memory_space<vmem>>, %arg5: memref<128x128xf32, #tpu.memory_space<vmem>>, %arg6: memref<1x128xf32, #tpu.memory_space<vmem>>, %arg7: memref<1x128xf32, #tpu.memory_space<vmem>>, %arg8: memref<1x128xf32, #tpu.memory_space<vmem>>, %arg9: memref<1x128xf32, #tpu.memory_space<vmem>>, %arg10: memref<1x128xf32, #tpu.memory_space<vmem>>, %arg11: memref<8x128xf32, #tpu.memory_space<vmem>>, %arg12: memref<8x128xf32, #tpu.memory_space<vmem>>) attributes {dimension_semantics = [#tpu.dimension_semantics<parallel>, #tpu.dimension_semantics<parallel>, #tpu.dimension_semantics<arbitrary>], iteration_bounds = array<i64: 1, 1, 1>, scalar_prefetch = 0 : i64, scratch_operands = 1 : i64, tpu.core_type = #tpu.core_type<tc>, window_params = [{transform_indices = @transform_0, window_bounds = array<i64: 8, 128>}, {transform_indices = @transform_1, window_bounds = array<i64: 128, 128>}, {transform_indices = @transform_2, window_bounds = array<i64: 128, 128>}, {transform_indices = @transform_3, window_bounds = array<i64: 1, 128>}, {transform_indices = @transform_4, window_bounds = array<i64: 1, 128>}, {transform_indices = @transform_5, window_bounds = array<i64: 1, 128>}, {transform_indices = @transform_6, window_bounds = array<i64: 1, 128>}, {transform_indices = @transform_7, window_bounds = array<i64: 1, 128>}, {transform_indices = @transform_8, window_bounds = array<i64: 8, 128>}]} {
    %c0_i32 = arith.constant 0 : i32
    %0 = arith.cmpi eq, %arg2, %c0_i32 : i32
    %1 = arith.extui %0 : i1 to i32
    %c0_i32_0 = arith.constant 0 : i32
    %2 = arith.cmpi ne, %1, %c0_i32_0 : i32
    scf.if %2 {
      %cst_17 = arith.constant 0.000000e+00 : f32
      %21 = vector.broadcast %cst_17 : f32 to vector<8x128xf32>
      %c0_18 = arith.constant 0 : index
      %c0_19 = arith.constant 0 : index
      %22 = vector.load %arg12[%c0_18, %c0_19] : memref<8x128xf32, #tpu.memory_space<vmem>>, vector<8x128xf32>
      tpu.vector_store %arg12[%c0_18, %c0_19], %21 {strides = array<i32>} : memref<8x128xf32, #tpu.memory_space<vmem>>, vector<8x128xf32>,
    } else {
    }
    %c0 = arith.constant 0 : index
    %c0_1 = arith.constant 0 : index
    %3 = vector.load %arg3[%c0, %c0_1] : memref<8x128xf32, #tpu.memory_space<vmem>>, vector<8x128xf32>
    %c0_2 = arith.constant 0 : index
    %c0_3 = arith.constant 0 : index
    %4 = vector.load %arg6[%c0_2, %c0_3] : memref<1x128xf32, #tpu.memory_space<vmem>>, vector<1x128xf32>
    %5 = vector.broadcast %4 : vector<1x128xf32> to vector<8x128xf32>
    %6 = arith.mulf %3, %5 : vector<8x128xf32>
    %c0_4 = arith.constant 0 : index
    %c0_5 = arith.constant 0 : index
    %7 = vector.load %arg4[%c0_4, %c0_5] : memref<128x128xf32, #tpu.memory_space<vmem>>, vector<128x128xf32>
    %cst = arith.constant dense<0.000000e+00> : vector<8x128xf32>
    %8 = tpu.matmul %3, %7, %cst {dimension_numbers = #tpu.dot_dimension_numbers<[1], [1], [0], [0], [0, 0, 1, 0], [], []>} : vector<8x128xf32>, vector<128x128xf32>, vector<8x128xf32> -> vector<8x128xf32>
    %c0_6 = arith.constant 0 : index
    %c0_7 = arith.constant 0 : index
    %9 = vector.load %arg5[%c0_6, %c0_7] : memref<128x128xf32, #tpu.memory_space<vmem>>, vector<128x128xf32>
    %cst_8 = arith.constant dense<0.000000e+00> : vector<8x128xf32>
    %10 = tpu.matmul %6, %9, %cst_8 {dimension_numbers = #tpu.dot_dimension_numbers<[1], [1], [0], [0], [0, 0, 1, 0], [], []>} : vector<8x128xf32>, vector<128x128xf32>, vector<8x128xf32> -> vector<8x128xf32>
    %c0_9 = arith.constant 0 : index
    %c0_10 = arith.constant 0 : index
    %11 = vector.load %arg12[%c0_9, %c0_10] : memref<8x128xf32, #tpu.memory_space<vmem>>, vector<8x128xf32>
    %c0_11 = arith.constant 0 : index
    %c0_12 = arith.constant 0 : index
    %12 = vector.load %arg7[%c0_11, %c0_12] : memref<1x128xf32, #tpu.memory_space<vmem>>, vector<1x128xf32>
    %13 = vector.broadcast %12 : vector<1x128xf32> to vector<8x128xf32>
    %14 = arith.mulf %10, %13 : vector<8x128xf32>
    %15 = arith.addf %8, %14 : vector<8x128xf32>
    %16 = arith.addf %11, %15 : vector<8x128xf32>
    %c0_13 = arith.constant 0 : index
    %c0_14 = arith.constant 0 : index
    %17 = vector.load %arg12[%c0_13, %c0_14] : memref<8x128xf32, #tpu.memory_space<vmem>>, vector<8x128xf32>
    tpu.vector_store %arg12[%c0_13, %c0_14], %16 {strides = array<i32>} : memref<8x128xf32, #tpu.memory_space<vmem>>, vector<8x128xf32>,
    %c0_i32_15 = arith.constant 0 : i32
    %18 = arith.cmpi eq, %arg2, %c0_i32_15 : i32
    %19 = arith.extui %18 : i1 to i32
    %c0_i32_16 = arith.constant 0 : i32
    %20 = arith.cmpi ne, %19, %c0_i32_16 : i32
    scf.if %20 {
      %c0_17 = arith.constant 0 : index
      %c0_18 = arith.constant 0 : index
      %21 = vector.load %arg8[%c0_17, %c0_18] : memref<1x128xf32, #tpu.memory_space<vmem>>, vector<1x128xf32>
      %c0_19 = arith.constant 0 : index
      %c0_20 = arith.constant 0 : index
      %22 = vector.load %arg9[%c0_19, %c0_20] : memref<1x128xf32, #tpu.memory_space<vmem>>, vector<1x128xf32>
      %c0_21 = arith.constant 0 : index
      %c0_22 = arith.constant 0 : index
      %23 = vector.load %arg10[%c0_21, %c0_22] : memref<1x128xf32, #tpu.memory_space<vmem>>, vector<1x128xf32>
      %24 = arith.mulf %22, %23 : vector<1x128xf32>
      %25 = arith.addf %21, %24 : vector<1x128xf32>
      %c0_23 = arith.constant 0 : index
      %c0_24 = arith.constant 0 : index
      %26 = vector.load %arg12[%c0_23, %c0_24] : memref<8x128xf32, #tpu.memory_space<vmem>>, vector<8x128xf32>
      %27 = vector.broadcast %25 : vector<1x128xf32> to vector<8x128xf32>
      %28 = arith.addf %26, %27 : vector<8x128xf32>
      %c0_25 = arith.constant 0 : index
      %c0_26 = arith.constant 0 : index
      %29 = vector.load %arg11[%c0_25, %c0_26] : memref<8x128xf32, #tpu.memory_space<vmem>>, vector<8x128xf32>
      tpu.vector_store %arg11[%c0_25, %c0_26], %28 {strides = array<i32>} : memref<8x128xf32, #tpu.memory_space<vmem>>, vector<8x128xf32>,
    } else {
    }
    return
  }
  func.func @transform_0(%arg0: i32, %arg1: i32, %arg2: i32) -> (i32, i32) {
    %c0_i32 = arith.constant 0 : i32
    return %arg1, %arg2 : i32, i32
  }
  func.func @transform_1(%arg0: i32, %arg1: i32, %arg2: i32) -> (i32, i32) {
    %c0_i32 = arith.constant 0 : i32
    return %arg0, %arg2 : i32, i32
  }
  func.func @transform_2(%arg0: i32, %arg1: i32, %arg2: i32) -> (i32, i32) {
    %c0_i32 = arith.constant 0 : i32
    return %arg0, %arg2 : i32, i32
  }
  func.func @transform_3(%arg0: i32, %arg1: i32, %arg2: i32) -> (i32, i32) {
    %c0_i32 = arith.constant 0 : i32
    %c0_i32_0 = arith.constant 0 : i32
    return %c0_i32, %arg2 : i32, i32
  }
  func.func @transform_4(%arg0: i32, %arg1: i32, %arg2: i32) -> (i32, i32) {
    %c0_i32 = arith.constant 0 : i32
    %c0_i32_0 = arith.constant 0 : i32
    return %c0_i32, %arg0 : i32, i32
  }
  func.func @transform_5(%arg0: i32, %arg1: i32, %arg2: i32) -> (i32, i32) {
    %c0_i32 = arith.constant 0 : i32
    %c0_i32_0 = arith.constant 0 : i32
    return %c0_i32, %arg0 : i32, i32
  }
  func.func @transform_6(%arg0: i32, %arg1: i32, %arg2: i32) -> (i32, i32) {
    %c0_i32 = arith.constant 0 : i32
    %c0_i32_0 = arith.constant 0 : i32
    return %c0_i32, %arg0 : i32, i32
  }
  func.func @transform_7(%arg0: i32, %arg1: i32, %arg2: i32) -> (i32, i32) {
    %c0_i32 = arith.constant 0 : i32
    %c0_i32_0 = arith.constant 0 : i32
    return %c0_i32, %arg0 : i32, i32
  }
  func.func @transform_8(%arg0: i32, %arg1: i32, %arg2: i32) -> (i32, i32) {
    %c0_i32 = arith.constant 0 : i32
    return %arg1, %arg0 : i32, i32
  }
}

</mosaic_0001>

<bundles_post_ra>
// kernel: tpu_custom_call.1
= control target key start
LH: loop header
LB: loop body
LE: loop exit
PB: predicated region body
PF: predicated region fallthrough
CT: control target
= control target key end

     0   :  { %13 = vsyncpa [#allocation4], 0  ;;  %s613_s0 = inlined_call_operand.hbm [shape: f32[8,128], index: 0, kind: input, shape index: {}]   ;;  %s614_s1 = inlined_call_operand.hbm [shape: f32[128,128], index: 1, kind: input, shape index: {}]   ;;  %s615_s2 = inlined_call_operand.hbm [shape: f32[128,128], index: 2, kind: input, shape index: {}]   ;;  %s616_s3 = inlined_call_operand.vmem [shape: f32[1,128], index: 3, kind: input, shape index: {}]   ;;  %s617_s4 = inlined_call_operand.vmem [shape: f32[1,128], index: 4, kind: input, shape index: {}]   ;;  %s618_s5 = inlined_call_operand.vmem [shape: f32[1,128], index: 5, kind: input, shape index: {}]   ;;  %s619_s6 = inlined_call_operand.vmem [shape: f32[1,128], index: 6, kind: input, shape index: {}]   ;;  %s620_s7 = inlined_call_operand.vmem [shape: f32[1,128], index: 7, kind: input, shape index: {}]   ;;  %s621_s8 = inlined_call_operand.hbm [shape: f32[8,128], index: 8, kind: output, shape index: {}]  }
   0x1   :  { %14 = vsyncpa [#allocation7], 0 }
   0x2   :  { %15 = vsyncpa [#allocation5], 0  ;;  %s499_s27 = smov [#allocation6]  }
   0x3   :  { %s31_s28 = sshll.u32 %s499_s27, 4  ;;  %s32_s28 = int_to_ptr.vmem [resolvable:$true] %s31_s28 }
   0x4   :  { %s421_s29 = scalar_lea.vmem %s32_s28, 2048  ;;  %p426_p1 = scmp.lt.s32.totalorder %s32_s28, %s32_s28 }
   0x5   :  { %p422_p0 = scmp.ne.s32.totalorder %s32_s28, %s421_s29  ;;  %p427_p2 = scmp.lt.s32.totalorder %s421_s29, %s421_s29 }
   0x7   :  { %p428_p3 = por %p427_p2, %p426_p1 }
   0x9   :  { %p429_p4 = pnand %p428_p3, %p422_p0 }
   0xb   :  { %432 = shalt.err (!%p429_p4)
}
   0xc   :  { %s500_s30 = smov 128   ;;  %s501_s9 = smov 8  }
   0xd   :  { %37 = dma.hbm_to_vmem [thread:$0]  %s614_s1, 2048, %s32_s28, [#allocation7], %s500_s30, %s500_s30, %s501_s9  }
   0xe   :  { %s502_s12 = smov [#allocation3]   ;;  %s503_s14 = smov [#allocation8]  }
   0xf   :  { %s22_s13 = sshll.u32 %s502_s12, 4  ;;  %s43_s15 = sshll.u32 %s503_s14, 4  ;;  %s23_s13 = int_to_ptr.vmem [resolvable:$true] %s22_s13  ;;  %s44_s15 = int_to_ptr.vmem [resolvable:$true] %s43_s15 }
  0x10   :  { %s441_s16 = scalar_lea.vmem %s23_s13, 128  ;;  %p446_p6 = scmp.lt.s32.totalorder %s23_s13, %s23_s13 }
  0x11   :  { %p442_p5 = scmp.ne.s32.totalorder %s23_s13, %s441_s16  ;;  %p447_p7 = scmp.lt.s32.totalorder %s441_s16, %s441_s16 }
  0x13   :  { %p448_p8 = por %p447_p7, %p446_p6 }
  0x15   :  { %p449_p9 = pnand %p448_p8, %p442_p5 }
  0x17   :  { %452 = shalt.err (!%p449_p9)
}
  0x18   :  { %25 = dma.hbm_to_vmem [thread:$0]  %s613_s0, 128, %s23_s13, [#allocation4]  }
  0x19   :  { %s461_s19 = scalar_lea.vmem %s44_s15, 2048  ;;  %p466_p11 = scmp.lt.s32.totalorder %s44_s15, %s44_s15 }
  0x1a   :  { %p462_p10 = scmp.ne.s32.totalorder %s44_s15, %s461_s19  ;;  %p467_p12 = scmp.lt.s32.totalorder %s461_s19, %s461_s19 }
  0x1c   :  { %p468_p13 = por %p467_p12, %p466_p11 }
  0x1e   :  { %p469_p0 = pnand %p468_p13, %p462_p10 }
  0x20   :  { %472 = shalt.err (!%p469_p0)
}
  0x21   :  { %49 = dma.hbm_to_vmem [thread:$0]  %s615_s2, 2048, %s44_s15, [#allocation7], %s500_s30, %s500_s30, %s501_s9  }
  0x22   :  { %493 = dma.done.wait [#allocation4], 128  }
  0x23   :  { %494 = vsyncadd [#allocation4], 4294967168 }
  0x24   :  { %495 = dma.done.wait [#allocation7], 4096  }
  0x25   :  { %496 = vsyncadd [#allocation7], 4294963200  ;;  %v504_v0 = vmov 0.0   ;;  %vm505_vm0 = vmmov 0   ;;  %v114_v1 = vld [vmem:[#allocation8 + $0x78] sm:$0xff]  ;;  %v113_v3 = vld [vmem:[#allocation8 + $0x70] sm:$0xff]  ;;  %v276_v36 = vlaneseq }
  0x26   :  { %335 = vmatprep.subr.mxu0 %v504_v0  ;;  %370 = vmatprep.subr.mxu1 %v504_v0  ;;  %v98_v2 = vld [vmem:[#allocation6 + $0x78] sm:$0xff]  ;;  %v97_v4 = vld [vmem:[#allocation6 + $0x70] sm:$0xff]  ;;  %v112_v5 = vld [vmem:[#allocation8 + $0x68] sm:$0xff] }
  0x27   :  { %367 = vmatprep.mubr.msk.f32.mxu0 %vm505_vm0, %v504_v0  ;;  %402 = vmatprep.mubr.msk.f32.mxu1 %vm505_vm0, %v504_v0  ;;  %v96_v6 = vld [vmem:[#allocation6 + $0x68] sm:$0xff]  ;;  %v111_v7 = vld [vmem:[#allocation8 + $0x60] sm:$0xff]  ;;  %v110_v9 = vld [vmem:[#allocation8 + $0x58] sm:$0xff]  ;;  %v277_v40 = vshrl.u32 %v276_v36, 7 }
  0x28   :  { %336 = vmatpush3.xpose.msra.mxu0 %v114_v1  ;;  %371 = vmatpush3.xpose.msra.mxu1 %v98_v2  ;;  %v95_v8 = vld [vmem:[#allocation6 + $0x60] sm:$0xff]  ;;  %v94_v10 = vld [vmem:[#allocation6 + $0x58] sm:$0xff]  ;;  %v109_v11 = vld [vmem:[#allocation8 + $0x50] sm:$0xff] }
  0x29   :  { %337 = vmatprep.subr.mxu0 %v504_v0  ;;  %372 = vmatprep.subr.mxu1 %v504_v0  ;;  %v93_v12 = vld [vmem:[#allocation6 + $0x50] sm:$0xff]  ;;  %v108_v13 = vld [vmem:[#allocation8 + $0x48] sm:$0xff]  ;;  %v107_v15 = vld [vmem:[#allocation8 + $0x40] sm:$0xff]  ;;  %v278_v43 = vsub.s32 0, %v277_v40 }
  0x2a   :  { %v92_v14 = vld [vmem:[#allocation6 + $0x48] sm:$0xff]  ;;  %v91_v16 = vld [vmem:[#allocation6 + $0x40] sm:$0xff]  ;;  %v106_v17 = vld [vmem:[#allocation8 + $0x38] sm:$0xff] }
  0x2b   :  { %v90_v18 = vld [vmem:[#allocation6 + $0x38] sm:$0xff]  ;;  %v105_v19 = vld [vmem:[#allocation8 + $0x30] sm:$0xff]  ;;  %v104_v21 = vld [vmem:[#allocation8 + $0x28] sm:$0xff] }
  0x2c   :  { %338 = vmatpush3.xpose.msra.mxu0 %v113_v3  ;;  %373 = vmatpush3.xpose.msra.mxu1 %v97_v4  ;;  %v89_v20 = vld [vmem:[#allocation6 + $0x30] sm:$0xff]  ;;  %v88_v22 = vld [vmem:[#allocation6 + $0x28] sm:$0xff]  ;;  %v103_v23 = vld [vmem:[#allocation8 + $0x20] sm:$0xff] }
  0x2d   :  { %339 = vmatprep.subr.mxu0 %v504_v0  ;;  %374 = vmatprep.subr.mxu1 %v504_v0  ;;  %v87_v24 = vld [vmem:[#allocation6 + $0x20] sm:$0xff]  ;;  %v102_v25 = vld [vmem:[#allocation8 + $0x18] sm:$0xff]  ;;  %v101_v27 = vld [vmem:[#allocation8 + $0x10] sm:$0xff] }
  0x2e   :  { %v86_v26 = vld [vmem:[#allocation6 + $0x18] sm:$0xff]  ;;  %v85_v28 = vld [vmem:[#allocation6 + $0x10] sm:$0xff]  ;;  %v100_v29 = vld [vmem:[#allocation8 + $0x8] sm:$0xff] }
  0x2f   :  { %v84_v30 = vld [vmem:[#allocation6 + $0x8] sm:$0xff]  ;;  %v74_v31 = vld [vmem:[#allocation3] sm:$0xff]  ;;  %v99_v33 = vld [vmem:[#allocation8] sm:$0xff] }
  0x30   :  { %340 = vmatpush3.xpose.msra.mxu0 %v112_v5  ;;  %375 = vmatpush3.xpose.msra.mxu1 %v96_v6  ;;  %v299_v32 = vld [vmem:[%s616_s3] ss:$0 sm:$0xff]  ;;  %v83_v34 = vld [vmem:[#allocation6] sm:$0xff] }
  0x31   :  { %341 = vmatprep.subr.mxu0 %v504_v0  ;;  %376 = vmatprep.subr.mxu1 %v504_v0  ;;  %v82_v35 = vmul.f32 %v299_v32, %v74_v31  ;;  %v270_v37 = vld [vmem:[%s619_s6] sm:$0x1]  ;;  %s506_s6 = smov [#allocation9]  }
  0x32   :  { %v271_v38 = vld [vmem:[%s620_s7] sm:$0x1]  ;;  %s289_s7 = sshll.u32 %s506_s6, 4  ;;  %s290_s7 = int_to_ptr.vmem [resolvable:$true] %s289_s7 }
  0x33   :  { %v272_v39 = vmul.f32 %v271_v38, %v270_v37  ;;  %v269_v41 = vld [vmem:[%s618_s5] sm:$0x1]  ;;  %s473_s28 = scalar_lea.vmem %s290_s7, 128  ;;  %p478_p2 = scmp.lt.s32.totalorder %s290_s7, %s290_s7 }
  0x34   :  { %342 = vmatpush3.xpose.msra.mxu0 %v111_v7  ;;  %377 = vmatpush3.xpose.msra.mxu1 %v95_v8  ;;  %v300_v44 = vld [vmem:[%s617_s4] ss:$0 sm:$0xff]  ;;  %p474_p1 = scmp.ne.s32.totalorder %s290_s7, %s473_s28  ;;  %p479_p3 = scmp.lt.s32.totalorder %s473_s28, %s473_s28 }
  0x35   :  { %343 = vmatprep.subr.mxu0 %v504_v0  ;;  %378 = vmatprep.subr.mxu1 %v504_v0  ;;  %v273_v42 = vadd.f32 %v272_v39, %v269_v41 }
  0x36   :  { %p480_p4 = por %p479_p3, %p478_p2 }
  0x37   :  { %v279_v48 = vrot.slane %v273_v42, %v278_v43 }
  0x38   :  { %344 = vmatpush3.xpose.msra.mxu0 %v110_v9  ;;  %379 = vmatpush3.xpose.msra.mxu1 %v94_v10  ;;  %p481_p5 = pnand %p480_p4, %p474_p1 }
  0x39   :  { %345 = vmatprep.subr.mxu0 %v504_v0  ;;  %380 = vmatprep.subr.mxu1 %v504_v0 }
  0x3c   :  { %346 = vmatpush3.xpose.msra.mxu0 %v109_v11  ;;  %381 = vmatpush3.xpose.msra.mxu1 %v93_v12 }
  0x3d   :  { %347 = vmatprep.subr.mxu0 %v504_v0  ;;  %382 = vmatprep.subr.mxu1 %v504_v0 }
  0x40   :  { %348 = vmatpush3.xpose.msra.mxu0 %v108_v13  ;;  %383 = vmatpush3.xpose.msra.mxu1 %v92_v14 }
  0x41   :  { %349 = vmatprep.subr.mxu0 %v504_v0  ;;  %384 = vmatprep.subr.mxu1 %v504_v0 }
  0x44   :  { %350 = vmatpush3.xpose.msra.mxu0 %v107_v15  ;;  %385 = vmatpush3.xpose.msra.mxu1 %v91_v16 }
  0x45   :  { %351 = vmatprep.subr.mxu0 %v504_v0  ;;  %386 = vmatprep.subr.mxu1 %v504_v0 }
  0x48   :  { %352 = vmatpush3.xpose.msra.mxu0 %v106_v17  ;;  %387 = vmatpush3.xpose.msra.mxu1 %v90_v18 }
  0x49   :  { %353 = vmatprep.subr.mxu0 %v504_v0  ;;  %388 = vmatprep.subr.mxu1 %v504_v0 }
  0x4c   :  { %354 = vmatpush3.xpose.msra.mxu0 %v105_v19  ;;  %389 = vmatpush3.xpose.msra.mxu1 %v89_v20 }
  0x4d   :  { %355 = vmatprep.subr.mxu0 %v504_v0  ;;  %390 = vmatprep.subr.mxu1 %v504_v0 }
  0x50   :  { %356 = vmatpush3.xpose.msra.mxu0 %v104_v21  ;;  %391 = vmatpush3.xpose.msra.mxu1 %v88_v22 }
  0x51   :  { %357 = vmatprep.subr.mxu0 %v504_v0  ;;  %392 = vmatprep.subr.mxu1 %v504_v0 }
  0x54   :  { %358 = vmatpush3.xpose.msra.mxu0 %v103_v23  ;;  %393 = vmatpush3.xpose.msra.mxu1 %v87_v24 }
  0x55   :  { %359 = vmatprep.subr.mxu0 %v504_v0  ;;  %394 = vmatprep.subr.mxu1 %v504_v0 }
  0x58   :  { %360 = vmatpush3.xpose.msra.mxu0 %v102_v25  ;;  %395 = vmatpush3.xpose.msra.mxu1 %v86_v26 }
  0x59   :  { %361 = vmatprep.subr.mxu0 %v504_v0  ;;  %396 = vmatprep.subr.mxu1 %v504_v0 }
  0x5c   :  { %362 = vmatpush3.xpose.msra.mxu0 %v101_v27  ;;  %397 = vmatpush3.xpose.msra.mxu1 %v85_v28 }
  0x5d   :  { %363 = vmatprep.subr.mxu0 %v504_v0  ;;  %398 = vmatprep.subr.mxu1 %v504_v0 }
  0x60   :  { %364 = vmatpush3.xpose.msra.mxu0 %v100_v29  ;;  %399 = vmatpush3.xpose.msra.mxu1 %v84_v30 }
  0x61   :  { %365 = vmatprep.subr.mxu0 %v504_v0  ;;  %400 = vmatprep.subr.mxu1 %v504_v0 }
  0x64   :  { %366 = vmatpush3.xpose.msra.mxu0 %v99_v33  ;;  %401 = vmatpush3.xpose.msra.mxu1 %v83_v34 }
  0x67   :  { %368 = vmatmul.mubr.f32.vlgmr.msra.gmra.mxu0 %v82_v35  ;;  %403 = vmatmul.mubr.f32.vlgmr.msra.gmra.mxu1 %v74_v31 }
 0x127   :  { %v181_v45 = vpop.f32.mrf.mxu0  ;;  %v260_v46 = vpop.f32.mrf.mxu1 }
 0x128   :  { %v193_v47 = vmul.f32 %v300_v44, %v181_v45 }
 0x129   :  { %v369_v49 = vpop.f32.mrf.mxu0  ;;  %v404_v50 = vpop.f32.mrf.mxu1 }
 0x12a   :  { %v261_v51 = vadd.f32 %v260_v46, %v193_v47 }
 0x12c   :  { %v281_v52 = vadd.f32 %v279_v48, %v261_v51 }
 0x12e   :  { %282 = vst [vmem:[#allocation9] sm:$0xff] %v281_v52 }
 0x12f   :  { %484 = shalt.err (!%p481_p5)
}
 0x130   :  { %292 = dma.vmem_to_hbm [thread:$0]  %s290_s7, 128, %s621_s8, [#allocation5]  }
 0x131   :  { %497 = dma.done.wait [#allocation5], 128  }
 0x132   :  { %498 = vsyncadd [#allocation5], 4294967168 }
 0x133   :  { %296 = vsyncpa [#allocation4], 1 }
 0x134   :  { %297 = vsyncpa [#allocation7], 1 }
 0x135   :  { %298 = vsyncpa [#allocation5], 1 }

</bundles_post_ra>
